<compile_context>
chip_gen: v7x
topology: tpu7x:2x2x1
jax: 0.10.0
libtpu: 0.0.40
codegen_flags: <defaults>
</compile_context>

<pallas_src>
import functools

import jax
import jax.numpy as jnp
from jax.experimental import pallas as pl
from jax.experimental.pallas import tpu as pltpu


def _round_up(x, m):
    return ((x + m - 1) // m) * m


def _cdiv(a, b):
    return -(-a // b)


# ---------------------------------------------------------------------------
# Pallas kernels
# ---------------------------------------------------------------------------
def _stats_kernel(a_ref, b_ref, sum_ref, sumsq_ref):
    """im2col matmul -> per-channel sum / sum-of-squares only (no conv store).

    Grid = (n_outer "parallel", n_inner "arbitrary").  Each outer index owns
    its own resident (8, Np) partial-stats block (row 0 carries the data, rows
    1..7 stay zero), so on v7x both TensorCores accumulate independently and
    the wrapper reduces the partials.  Padded rows/lanes are exact zeros.
    """
    @pl.when(pl.program_id(1) == 0)
    def _():
        sum_ref[...] = jnp.zeros_like(sum_ref)
        sumsq_ref[...] = jnp.zeros_like(sumsq_ref)

    acc = jnp.dot(a_ref[...], b_ref[...], preferred_element_type=jnp.float32)
    sum_ref[0:1, :] += jnp.sum(acc, axis=0, keepdims=True)
    sumsq_ref[0:1, :] += jnp.sum(acc * acc, axis=0, keepdims=True)


def _conv_stats_kernel(a_ref, b_ref, conv_ref, sum_ref, sumsq_ref):
    """Large-Cin path: same as _stats_kernel but also stores the conv tile as
    bf16 (stats still come from the f32 accumulator)."""
    @pl.when(pl.program_id(1) == 0)
    def _():
        sum_ref[...] = jnp.zeros_like(sum_ref)
        sumsq_ref[...] = jnp.zeros_like(sumsq_ref)

    acc = jnp.dot(a_ref[...], b_ref[...], preferred_element_type=jnp.float32)
    conv_ref[...] = acc.astype(conv_ref.dtype)
    sum_ref[0:1, :] += jnp.sum(acc, axis=0, keepdims=True)
    sumsq_ref[0:1, :] += jnp.sum(acc * acc, axis=0, keepdims=True)


def _matmul_bn_lrelu_kernel(a_ref, b_ref, scale_ref, shift_ref, o_ref, *,
                            neg_slope, cout):
    """Recompute matmul, apply affine BN + LeakyReLU, store (tm, Cout) f32."""
    acc = jnp.dot(a_ref[...], b_ref[...], preferred_element_type=jnp.float32)
    z = acc * scale_ref[...] + shift_ref[...]
    z = jnp.where(z >= 0, z, neg_slope * z)
    o_ref[...] = z[:, :cout]


def _bn_lrelu_kernel(y_ref, scale_ref, shift_ref, o_ref, *, neg_slope, cout):
    """Large-Cin path: read bf16 conv tile, upcast, BN + LeakyReLU (f32)."""
    y = y_ref[...].astype(jnp.float32)
    z = y * scale_ref[...] + shift_ref[...]
    z = jnp.where(z >= 0, z, neg_slope * z)
    o_ref[...] = z[:, :cout]


# ---------------------------------------------------------------------------
# Wrapper (layout changes, reflect padding, im2col, parameter reshapes)
# ---------------------------------------------------------------------------
def cnn_block_forward(x, weight, gamma, beta, *, stride, eps=1e-5,
                      neg_slope=0.2):
    """x: (N, Cin, H, W) f32; weight: (Cout, Cin, 4, 4); gamma/beta: (Cout,)."""
    N, Cin, H, W = x.shape
    Cout = weight.shape[0]
    KH = KW = 4
    pad = 1
    OH = (H + 2 * pad - KH) // stride + 1
    OW = (W + 2 * pad - KW) // stride + 1

    # NHWC + bf16 BEFORE reflect-pad / im2col: halves pre-kernel XLA traffic
    # (reflect padding only copies values, so the rounding point is identical).
    x_nhwc = jnp.transpose(x, (0, 2, 3, 1)).astype(jnp.bfloat16)
    xp = jnp.pad(x_nhwc, ((0, 0), (pad, pad), (pad, pad), (0, 0)),
                 mode="reflect")

    # im2col -> (M, K) with K ordered as [kh, kw, cin]
    # TODO(synk): build the (tm, K) patch tile inside the kernel from a
    # VMEM-resident padded-input block (manual DMA) instead of materializing
    # im2col in HBM; that would cut up to KH*KW/stride^2 x of input traffic.
    cols = []
    for kh in range(KH):
        for kw in range(KW):
            cols.append(xp[:, kh:kh + stride * OH:stride,
                           kw:kw + stride * OW:stride, :])
    patches = jnp.stack(cols, axis=3)              # (N, OH, OW, KH*KW, Cin) bf16
    M = N * OH * OW
    K = KH * KW * Cin                              # multiple of 16 -> no K pad

    a = patches.reshape(M, K)                      # bf16
    # weight (Cout, Cin, KH, KW) -> (K, Cout) matching [kh, kw, cin] ordering
    b = jnp.transpose(weight, (2, 3, 1, 0)).reshape(K, Cout).astype(jnp.bfloat16)

    Np = _round_up(Cout, 128)                      # lane-dense matmul N dim

    # ---- tile / VMEM sizing (per generation) --------------------------------
    try:
        phys_vmem = int(pltpu.get_tpu_info().vmem_capacity_bytes)
    except Exception:                               # pragma: no cover
        phys_vmem = 64 * 1024 * 1024               # conservative (v7x per-TC)
    vmem_cap = (3 * phys_vmem) // 4                # ~96 MiB v5e/v6e, ~48 MiB v7x

    # Per-row bytes across the worst kernel: A (bf16, double-buffered) +
    # bf16 conv / f32 acc tile + f32 output (double-buffered).
    per_row = 4 * K + 8 * Np + 8 * Cout
    # Fixed: weight (bf16, both pipeline buffers counted), stats, margin.
    fixed = 2 * (K * Np * 2) + 4 * (8 * Np * 4) + (4 << 20)

    target = max((vmem_cap - fixed) // per_row, 256)
    target = int(min(target, 2048, _round_up(M, 16)))

    n_tiles = max(1, _cdiv(M, target))
    n_outer = 2 if n_tiles >= 2 else 1             # v7x: shard stats over 2 TCs
    n_tiles = _cdiv(n_tiles, n_outer) * n_outer
    tm = _round_up(_cdiv(M, n_tiles), 16)          # minimize Mp - M padding
    Mp = tm * n_tiles
    n_inner = n_tiles // n_outer

    a_p = jnp.pad(a, ((0, Mp - M), (0, 0)))        # padded rows: exact zeros
    b_p = jnp.pad(b, ((0, 0), (0, Np - Cout)))     # padded lanes: exact zeros

    vmem_need = fixed + per_row * tm
    vmem_limit = int(min(max(vmem_need, 32 * 1024 * 1024), vmem_cap))

    cparams_stats = pltpu.CompilerParams(
        dimension_semantics=("parallel", "arbitrary"),
        vmem_limit_bytes=vmem_limit)
    cparams_par = pltpu.CompilerParams(
        dimension_semantics=("parallel",),
        vmem_limit_bytes=vmem_limit)

    a_spec2 = pl.BlockSpec((tm, K), lambda o, i: (o * n_inner + i, 0))
    w_spec2 = pl.BlockSpec((K, Np), lambda o, i: (0, 0))     # VMEM-resident
    stat_spec = pl.BlockSpec((8, Np), lambda o, i: (o, 0))
    stat_shape = jax.ShapeDtypeStruct((8 * n_outer, Np), jnp.float32)

    # Small-Cin regime: recomputing the matmul in pass 2 is cheaper than
    # writing + re-reading a bf16 conv intermediate (2*K <= 4*Np).
    recompute = (2 * K) <= (4 * Np)

    # ---- pass 1: batch statistics (and conv intermediate for large Cin) ----
    if recompute:
        psum, psumsq = pl.pallas_call(
            _stats_kernel,
            out_shape=(stat_shape, stat_shape),
            grid_spec=pltpu.PrefetchScalarGridSpec(
                num_scalar_prefetch=0,
                grid=(n_outer, n_inner),
                in_specs=[a_spec2, w_spec2],
                out_specs=(stat_spec, stat_spec)),
            compiler_params=cparams_stats,
        )(a_p, b_p)
        conv_bf16 = None
    else:
        conv_bf16, psum, psumsq = pl.pallas_call(
            _conv_stats_kernel,
            out_shape=(jax.ShapeDtypeStruct((Mp, Np), jnp.bfloat16),
                       stat_shape, stat_shape),
            grid_spec=pltpu.PrefetchScalarGridSpec(
                num_scalar_prefetch=0,
                grid=(n_outer, n_inner),
                in_specs=[a_spec2, w_spec2],
                out_specs=(pl.BlockSpec((tm, Np),
                                        lambda o, i: (o * n_inner + i, 0)),
                           stat_spec, stat_spec)),
            compiler_params=cparams_stats,
        )(a_p, b_p)

    # BatchNorm (training mode) scale/shift from batch statistics (f32).
    s = jnp.sum(psum, axis=0, keepdims=True)       # rows 1..7 per group are 0
    ss = jnp.sum(psumsq, axis=0, keepdims=True)
    mean = s / M
    var = jnp.maximum(ss / M - mean * mean, 0.0)   # biased var, clamped >= 0
    gamma_p = jnp.pad(gamma.astype(jnp.float32), (0, Np - Cout)).reshape(1, Np)
    beta_p = jnp.pad(beta.astype(jnp.float32), (0, Np - Cout)).reshape(1, Np)
    scale = gamma_p * jax.lax.rsqrt(var + eps)
    shift = beta_p - mean * scale

    # ---- pass 2: normalize + LeakyReLU, lane-narrow (Mp, Cout) output ------
    out_spec = pl.BlockSpec((tm, Cout), lambda i: (i, 0))
    vec_spec = pl.BlockSpec((1, Np), lambda i: (0, 0))

    if recompute:
        out = pl.pallas_call(
            functools.partial(_matmul_bn_lrelu_kernel,
                              neg_slope=neg_slope, cout=Cout),
            out_shape=jax.ShapeDtypeStruct((Mp, Cout), jnp.float32),
            grid_spec=pltpu.PrefetchScalarGridSpec(
                num_scalar_prefetch=0,
                grid=(n_tiles,),
                in_specs=[pl.BlockSpec((tm, K), lambda i: (i, 0)),
                          pl.BlockSpec((K, Np), lambda i: (0, 0)),
                          vec_spec, vec_spec],
                out_specs=out_spec),
            compiler_params=cparams_par,
        )(a_p, b_p, scale, shift)
    else:
        out = pl.pallas_call(
            functools.partial(_bn_lrelu_kernel,
                              neg_slope=neg_slope, cout=Cout),
            out_shape=jax.ShapeDtypeStruct((Mp, Cout), jnp.float32),
            grid_spec=pltpu.PrefetchScalarGridSpec(
                num_scalar_prefetch=0,
                grid=(n_tiles,),
                in_specs=[pl.BlockSpec((tm, Np), lambda i: (i, 0)),
                          vec_spec, vec_spec],
                out_specs=out_spec),
            compiler_params=cparams_par,
        )(conv_bf16, scale, shift)

    # Output rows are already NHWC-ordered; only the NCHW transpose (kept for
    # parity with the PyTorch module) remains.
    # TODO(synk): emit NHWC directly if downstream consumers accept it.
    y = out[:M].reshape(N, OH, OW, Cout)
    return jnp.transpose(y, (0, 3, 1, 2))          # back to NCHW


if __name__ == "__main__":
    key = jax.random.PRNGKey(0)
    k_x, k_w = jax.random.split(key)

    N, Cin, H, W = 2, 4, 16, 16
    Cout, stride = 8, 2

    x = jax.random.normal(k_x, (N, Cin, H, W), dtype=jnp.float32)
    # deterministic synthetic parameters (Conv2d weight; BN gamma=1, beta=0)
    weight = 0.02 * jax.random.normal(k_w, (Cout, Cin, 4, 4), dtype=jnp.float32)
    gamma = jnp.ones((Cout,), jnp.float32)
    beta = jnp.zeros((Cout,), jnp.float32)

    out = cnn_block_forward(x, weight, gamma, beta, stride=stride)
    out = jax.block_until_ready(out)
    assert out.shape == (N, Cout, (H + 2 - 4) // stride + 1,
                         (W + 2 - 4) // stride + 1)
    print("KERNEL_OK")
</pallas_src>

<mosaic_0001>
module attributes {stable_mosaic.version = 11 : i64} {
  func.func @_stats_kernel(%arg0: i32, %arg1: i32, %arg2: memref<128x64xbf16, #tpu.memory_space<vmem>>, %arg3: memref<64x128xbf16, #tpu.memory_space<vmem>>, %arg4: memref<8x128xf32, #tpu.memory_space<vmem>>, %arg5: memref<8x128xf32, #tpu.memory_space<vmem>>) attributes {dimension_semantics = [#tpu.dimension_semantics<parallel>, #tpu.dimension_semantics<arbitrary>], iteration_bounds = array<i64: 1, 1>, scalar_prefetch = 0 : i64, scratch_operands = 0 : i64, tpu.core_type = #tpu.core_type<tc>, window_params = [{transform_indices = @transform_0, window_bounds = array<i64: 128, 64>}, {pipeline_mode = #tpu.pipeline_mode<synchronous>, transform_indices = @transform_1, window_bounds = array<i64: 64, 128>}, {transform_indices = @transform_2, window_bounds = array<i64: 8, 128>}, {transform_indices = @transform_3, window_bounds = array<i64: 8, 128>}]} {
    %c0_i32 = arith.constant 0 : i32
    %0 = arith.cmpi eq, %arg1, %c0_i32 : i32
    %1 = arith.extui %0 : i1 to i32
    %c0_i32_0 = arith.constant 0 : i32
    %2 = arith.cmpi ne, %1, %c0_i32_0 : i32
    scf.if %2 {
      %cst_14 = arith.constant 0.000000e+00 : f32
      %17 = vector.broadcast %cst_14 : f32 to vector<8x128xf32>
      %c0_15 = arith.constant 0 : index
      %c0_16 = arith.constant 0 : index
      %18 = vector.load %arg4[%c0_15, %c0_16] : memref<8x128xf32, #tpu.memory_space<vmem>>, vector<8x128xf32>
      tpu.vector_store %arg4[%c0_15, %c0_16], %17 {strides = array<i32>} : memref<8x128xf32, #tpu.memory_space<vmem>>, vector<8x128xf32>,
      %cst_17 = arith.constant 0.000000e+00 : f32
      %19 = vector.broadcast %cst_17 : f32 to vector<8x128xf32>
      %c0_18 = arith.constant 0 : index
      %c0_19 = arith.constant 0 : index
      %20 = vector.load %arg5[%c0_18, %c0_19] : memref<8x128xf32, #tpu.memory_space<vmem>>, vector<8x128xf32>
      tpu.vector_store %arg5[%c0_18, %c0_19], %19 {strides = array<i32>} : memref<8x128xf32, #tpu.memory_space<vmem>>, vector<8x128xf32>,
    } else {
    }
    %c0 = arith.constant 0 : index
    %c0_1 = arith.constant 0 : index
    %3 = vector.load %arg2[%c0, %c0_1] : memref<128x64xbf16, #tpu.memory_space<vmem>>, vector<128x64xbf16>
    %c0_2 = arith.constant 0 : index
    %c0_3 = arith.constant 0 : index
    %4 = vector.load %arg3[%c0_2, %c0_3] : memref<64x128xbf16, #tpu.memory_space<vmem>>, vector<64x128xbf16>
    %cst = arith.constant dense<0.000000e+00> : vector<128x128xf32>
    %5 = tpu.matmul %3, %4, %cst {dimension_numbers = #tpu.dot_dimension_numbers<[1], [0], [0], [1], [0, 0, 1, 1], [], []>} : vector<128x64xbf16>, vector<64x128xbf16>, vector<128x128xf32> -> vector<128x128xf32>
    %c0_4 = arith.constant 0 : index
    %c0_5 = arith.constant 0 : index
    %6 = vector.load %arg4[%c0_4, %c0_5] : memref<8x128xf32, #tpu.memory_space<vmem>>, vector<1x128xf32>
    %cst_6 = arith.constant dense<0.000000e+00> : vector<128xf32>
    %7 = vector.multi_reduction <add>, %5, %cst_6 [0] : vector<128x128xf32> to vector<128xf32>
    %8 = vector.shape_cast %7 : vector<128xf32> to vector<1x128xf32>
    %9 = arith.addf %6, %8 : vector<1x128xf32>
    %c0_7 = arith.constant 0 : index
    %c0_8 = arith.constant 0 : index
    %10 = vector.load %arg4[%c0_7, %c0_8] : memref<8x128xf32, #tpu.memory_space<vmem>>, vector<1x128xf32>
    tpu.vector_store %arg4[%c0_7, %c0_8], %9 {strides = array<i32>} : memref<8x128xf32, #tpu.memory_space<vmem>>, vector<1x128xf32>,
    %c0_9 = arith.constant 0 : index
    %c0_10 = arith.constant 0 : index
    %11 = vector.load %arg5[%c0_9, %c0_10] : memref<8x128xf32, #tpu.memory_space<vmem>>, vector<1x128xf32>
    %12 = arith.mulf %5, %5 : vector<128x128xf32>
    %cst_11 = arith.constant dense<0.000000e+00> : vector<128xf32>
    %13 = vector.multi_reduction <add>, %12, %cst_11 [0] : vector<128x128xf32> to vector<128xf32>
    %14 = vector.shape_cast %13 : vector<128xf32> to vector<1x128xf32>
    %15 = arith.addf %11, %14 : vector<1x128xf32>
    %c0_12 = arith.constant 0 : index
    %c0_13 = arith.constant 0 : index
    %16 = vector.load %arg5[%c0_12, %c0_13] : memref<8x128xf32, #tpu.memory_space<vmem>>, vector<1x128xf32>
    tpu.vector_store %arg5[%c0_12, %c0_13], %15 {strides = array<i32>} : memref<8x128xf32, #tpu.memory_space<vmem>>, vector<1x128xf32>,
    return
  }
  func.func @transform_0(%arg0: i32, %arg1: i32) -> (i32, i32) {
    %c1_i32 = arith.constant 1 : i32
    %0 = arith.muli %arg0, %c1_i32 : i32
    %1 = arith.addi %0, %arg1 : i32
    %c0_i32 = arith.constant 0 : i32
    %c0_i32_0 = arith.constant 0 : i32
    return %1, %c0_i32 : i32, i32
  }
  func.func @transform_1(%arg0: i32, %arg1: i32) -> (i32, i32) {
    %c0_i32 = arith.constant 0 : i32
    %c0_i32_0 = arith.constant 0 : i32
    %c0_i32_1 = arith.constant 0 : i32
    return %c0_i32, %c0_i32_0 : i32, i32
  }
  func.func @transform_2(%arg0: i32, %arg1: i32) -> (i32, i32) {
    %c0_i32 = arith.constant 0 : i32
    %c0_i32_0 = arith.constant 0 : i32
    return %arg0, %c0_i32 : i32, i32
  }
  func.func @transform_3(%arg0: i32, %arg1: i32) -> (i32, i32) {
    %c0_i32 = arith.constant 0 : i32
    %c0_i32_0 = arith.constant 0 : i32
    return %arg0, %c0_i32 : i32, i32
  }
}

</mosaic_0001>

<bundles_post_ra>
// kernel: tpu_custom_call.1
= control target key start
LH: loop header
LB: loop body
LE: loop exit
PB: predicated region body
PF: predicated region fallthrough
CT: control target
= control target key end

     0   :  { %9 = vsyncpa [#allocation3], 0  ;;  %vm132_vm0 = vcmask 523264   ;;  %s570_s0 = inlined_call_operand.vmem [shape: bf16[128,64], index: 0, kind: input, shape index: {}]   ;;  %s571_s1 = inlined_call_operand.vmem [shape: bf16[64,128], index: 1, kind: input, shape index: {}]   ;;  %s572_s2 = inlined_call_operand.hbm [shape: f32[8,128], index: 2, kind: output, shape index: {0}]   ;;  %s573_s3 = inlined_call_operand.hbm [shape: f32[8,128], index: 3, kind: output, shape index: {1}]  }
   0x1   :  { %v419_v0 = vld [vmem:[%s571_s1] sm:$0xff]   ;;  %v420_v1 = vld [vmem:[%s571_s1 + $0x8] sm:$0xff]   ;;  %v421_v2 = vld [vmem:[%s571_s1 + $0x10] sm:$0xff]  }
   0x2   :  { %384 = vmatprep.subr.bf16.mxu0 %v419_v0  ;;  %408 = vmatprep.subr.bf16.mxu1 %v419_v0  ;;  %v423_v3 = vld [vmem:[%s570_s0] sm:$0xff]   ;;  %v422_v4 = vld [vmem:[%s571_s1 + $0x18] sm:$0xff]  }
   0x3   :  { %385 = vmatpush3.bf16.msra.mxu0 %v419_v0  ;;  %412 = vmatpush3.bf16.msra.mxu1 %v419_v0  ;;  %v427_v5 = vld [vmem:[%s570_s0 + $0x20] sm:$0xff]  }
   0x4   :  { %386 = vmatprep.subr.bf16.mxu0 %v420_v1  ;;  %409 = vmatprep.subr.bf16.mxu1 %v420_v1 }
   0x5   :  { %392 = vmatprep.mubr.msk.bf16.mxu0 %vm132_vm0, %v423_v3  ;;  %400 = vmatprep.mubr.msk.bf16.mxu1 %vm132_vm0, %v427_v5 }
   0x7   :  { %387 = vmatpush3.bf16.msra.mxu0 %v420_v1  ;;  %413 = vmatpush3.bf16.msra.mxu1 %v420_v1 }
   0x8   :  { %388 = vmatprep.subr.bf16.mxu0 %v421_v2  ;;  %410 = vmatprep.subr.bf16.mxu1 %v421_v2 }
   0xb   :  { %389 = vmatpush3.bf16.msra.mxu0 %v421_v2  ;;  %414 = vmatpush3.bf16.msra.mxu1 %v421_v2 }
   0xc   :  { %390 = vmatprep.subr.bf16.mxu0 %v422_v4  ;;  %411 = vmatprep.subr.bf16.mxu1 %v422_v4 }
   0xd   :  { %10 = vsyncpa [#allocation5], 0  ;;  %v424_v6 = vld [vmem:[%s570_s0 + $0x8] sm:$0xff]   ;;  %v425_v8 = vld [vmem:[%s570_s0 + $0x10] sm:$0xff]   ;;  %v479_v12 = vmov 0.0   ;;  %s481_s9 = smov [#allocation4]  }
   0xe   :  { %v428_v7 = vld [vmem:[%s570_s0 + $0x28] sm:$0xff]   ;;  %v429_v9 = vld [vmem:[%s570_s0 + $0x30] sm:$0xff]   ;;  %v426_v10 = vld [vmem:[%s570_s0 + $0x18] sm:$0xff]   ;;  %42 = vst [vmem:[#allocation2] sm:$0xff] %v479_v12  ;;  %s334_s10 = sshll.u32 %s481_s9, 4  ;;  %s335_s10 = int_to_ptr.vmem [resolvable:$true] %s334_s10 }
   0xf   :  { %391 = vmatpush3.bf16.msra.mxu0 %v422_v4  ;;  %415 = vmatpush3.bf16.msra.mxu1 %v422_v4  ;;  %v430_v11 = vld [vmem:[%s570_s0 + $0x38] sm:$0xff]   ;;  %43 = vst [vmem:[#allocation4] sm:$0xff] %v479_v12  ;;  %s480_s0 = smov [#allocation2]  }
  0x10   :  { %s324_s8 = sshll.u32 %s480_s0, 4  ;;  %s325_s8 = int_to_ptr.vmem [resolvable:$true] %s324_s8 }
  0x11   :  { %s431_s11 = scalar_lea.vmem %s325_s8, 128  ;;  %p436_p1 = scmp.lt.s32.totalorder %s325_s8, %s325_s8 }
  0x12   :  { %393 = vmatmul.mubr.msk.bf16.vlgmr.msra.gmra.mrb[0].mxu0 %vm132_vm0, %v424_v6  ;;  %401 = vmatmul.mubr.msk.bf16.vlgmr.msra.gmra.mrb[0].mxu1 %vm132_vm0, %v428_v7  ;;  %p432_p0 = scmp.ne.s32.totalorder %s325_s8, %s431_s11  ;;  %p437_p2 = scmp.lt.s32.totalorder %s431_s11, %s431_s11 }
  0x13   :  { %396 = vmatprep.mubr.msk.bf16.mxu0 %vm132_vm0, %v425_v8  ;;  %404 = vmatprep.mubr.msk.bf16.mxu1 %vm132_vm0, %v429_v9 }
  0x14   :  { %p438_p3 = por %p437_p2, %p436_p1 }
  0x16   :  { %p439_p4 = pnand %p438_p3, %p432_p0 }
  0x1a   :  { %397 = vmatmul.mubr.msk.bf16.gmra.mrb[4].mxu0 %vm132_vm0, %v426_v10  ;;  %405 = vmatmul.mubr.msk.bf16.gmra.mrb[4].mxu1 %vm132_vm0, %v430_v11 }
  0xe5   :  { %v394_v13 = vpop.f32.mrb[0].mxu0  ;;  %v402_v14 = vpop.f32.mrb[0].mxu1 }
  0xe6   :  { %v191_v15 = vpop.f32.mrb[1].mxu0  ;;  %v223_v16 = vpop.f32.mrb[1].mxu1  ;;  %v281_v24 = vmul.f32 %v394_v13, %v394_v13  ;;  %v289_v56 = vmul.f32 %v402_v14, %v402_v14 }
  0xe7   :  { %v395_v17 = vpop.f32.mrb[2].mxu0  ;;  %v403_v18 = vpop.f32.mrb[2].mxu1  ;;  %v279_v21 = vmul.f32 %v191_v15, %v191_v15  ;;  %v287_v50 = vmul.f32 %v223_v16, %v223_v16 }
  0xe8   :  { %v194_v19 = vpop.f32.mrb[3].mxu0  ;;  %v226_v20 = vpop.f32.mrb[3].mxu1  ;;  %v282_v27 = vmul.f32 %v395_v17, %v395_v17  ;;  %v290_v59 = vmul.f32 %v403_v18, %v403_v18 }
  0xe9   :  { %v255_v22 = vadd.f32 %v194_v19, %v191_v15  ;;  %v280_v23 = vmul.f32 %v194_v19, %v194_v19  ;;  %v288_v55 = vmul.f32 %v226_v20, %v226_v20 }
  0xeb   :  { %v256_v25 = vadd.f32 %v394_v13, %v255_v22  ;;  %v295_v26 = vadd.f32 %v280_v23, %v279_v21  ;;  %v278_v23 = vld [vmem:[#allocation4] sm:$0x1] }
  0xed   :  { %v296_v28 = vadd.f32 %v295_v26, %v281_v24  ;;  %v398_v29 = vpop.f32.mrb[4].mxu0  ;;  %v257_v30 = vadd.f32 %v395_v17, %v256_v25  ;;  %v406_v31 = vpop.f32.mrb[4].mxu1 }
  0xee   :  { %v207_v32 = vpop.f32.mrb[5].mxu0  ;;  %v239_v33 = vpop.f32.mrb[5].mxu1  ;;  %v285_v44 = vmul.f32 %v398_v29, %v398_v29  ;;  %v293_v4 = vmul.f32 %v406_v31, %v406_v31 }
  0xef   :  { %v258_v34 = vadd.f32 %v257_v30, %v207_v32  ;;  %v283_v35 = vmul.f32 %v207_v32, %v207_v32  ;;  %v297_v36 = vadd.f32 %v296_v28, %v282_v27  ;;  %v399_v37 = vpop.f32.mrb[6].mxu0  ;;  %v407_v38 = vpop.f32.mrb[6].mxu1  ;;  %v291_v62 = vmul.f32 %v239_v33, %v239_v33 }
  0xf0   :  { %v210_v39 = vpop.f32.mrb[7].mxu0  ;;  %v242_v40 = vpop.f32.mrb[7].mxu1  ;;  %v286_v47 = vmul.f32 %v399_v37, %v399_v37  ;;  %v294_v7 = vmul.f32 %v407_v38, %v407_v38 }
  0xf1   :  { %v298_v41 = vadd.f32 %v297_v36, %v283_v35  ;;  %v259_v42 = vadd.f32 %v258_v34, %v210_v39  ;;  %v284_v43 = vmul.f32 %v210_v39, %v210_v39  ;;  %v292_v3 = vmul.f32 %v242_v40, %v242_v40 }
  0xf3   :  { %v260_v45 = vadd.f32 %v398_v29, %v259_v42  ;;  %v299_v46 = vadd.f32 %v298_v41, %v284_v43 }
  0xf5   :  { %v300_v48 = vadd.f32 %v299_v46, %v285_v44  ;;  %v261_v49 = vadd.f32 %v399_v37, %v260_v45 }
  0xf7   :  { %v262_v51 = vadd.f32 %v261_v49, %v223_v16  ;;  %v301_v52 = vadd.f32 %v300_v48, %v286_v47 }
  0xf9   :  { %v302_v53 = vadd.f32 %v301_v52, %v287_v50  ;;  %v263_v54 = vadd.f32 %v262_v51, %v226_v20  ;;  %v254_v20 = vld [vmem:[#allocation2] sm:$0x1] }
  0xfb   :  { %v264_v57 = vadd.f32 %v402_v14, %v263_v54  ;;  %v303_v58 = vadd.f32 %v302_v53, %v288_v55 }
  0xfd   :  { %v304_v60 = vadd.f32 %v303_v58, %v289_v56  ;;  %v265_v61 = vadd.f32 %v403_v18, %v264_v57 }
  0xff   :  { %v266_v63 = vadd.f32 %v265_v61, %v239_v33  ;;  %v305_v0 = vadd.f32 %v304_v60, %v290_v59 }
 0x101   :  { %v306_v1 = vadd.f32 %v305_v0, %v291_v62  ;;  %v267_v2 = vadd.f32 %v266_v63, %v242_v40 }
 0x103   :  { %v268_v5 = vadd.f32 %v406_v31, %v267_v2  ;;  %v307_v6 = vadd.f32 %v306_v1, %v292_v3 }
 0x105   :  { %v269_v8 = vadd.f32 %v407_v38, %v268_v5  ;;  %v308_v9 = vadd.f32 %v307_v6, %v293_v4 }
 0x107   :  { %v270_v10 = vrot.slane %v269_v8, 4  ;;  %v309_v11 = vadd.f32 %v308_v9, %v294_v7 }
 0x109   :  { %v271_v12 = vadd.f32 %v270_v10, %v269_v8  ;;  %v310_v13 = vrot.slane %v309_v11, 4 }
 0x10b   :  { %v272_v14 = vrot.slane %v271_v12, 2  ;;  %v311_v15 = vadd.f32 %v310_v13, %v309_v11 }
 0x10d   :  { %v273_v16 = vadd.f32 %v272_v14, %v271_v12  ;;  %v312_v17 = vrot.slane %v311_v15, 2 }
 0x10f   :  { %v313_v18 = vadd.f32 %v312_v17, %v311_v15  ;;  %v274_v19 = vrot.slane %v273_v16, 1 }
 0x111   :  { %v275_v21 = vadd.f32 %v274_v19, %v273_v16  ;;  %v314_v22 = vrot.slane %v313_v18, 1 }
 0x113   :  { %v276_v24 = vadd.f32 %v275_v21, %v254_v20  ;;  %v315_v25 = vadd.f32 %v314_v22, %v313_v18 }
 0x115   :  { %277 = vst [vmem:[#allocation2] sm:$0x1] %v276_v24  ;;  %v316_v26 = vadd.f32 %v315_v25, %v278_v23 }
 0x116   :  { %442 = shalt.err (!%p439_p4)
}
 0x117   :  { %s443_s14 = scalar_lea.hbm %s572_s2, 128 }
 0x118   :  { %p444_p5 = scmp.ne.s32.totalorder %s572_s2, %s443_s14  ;;  %p447_p6 = scmp.lt.u32.totalorder %s443_s14, %s572_s2 }
 0x11a   :  { %p449_p7 = pnand %p447_p6, %p444_p5 }
 0x11c   :  { %452 = shalt.err (!%p449_p7)
}
 0x11d   :  { %327 = dma.vmem_to_hbm [thread:$0]  %s325_s8, 128, %s572_s2, [#allocation3]   ;;  %317 = vst [vmem:[#allocation4] sm:$0x1] %v316_v26 }
 0x11e   :  { %s453_s21 = scalar_lea.vmem %s335_s10, 128  ;;  %p458_p9 = scmp.lt.s32.totalorder %s335_s10, %s335_s10 }
 0x11f   :  { %p454_p8 = scmp.ne.s32.totalorder %s335_s10, %s453_s21  ;;  %p459_p10 = scmp.lt.s32.totalorder %s453_s21, %s453_s21 }
 0x121   :  { %p460_p11 = por %p459_p10, %p458_p9 }
 0x123   :  { %p461_p12 = pnand %p460_p11, %p454_p8 }
 0x125   :  { %464 = shalt.err (!%p461_p12)
}
 0x126   :  { %s465_s24 = scalar_lea.hbm %s573_s3, 128 }
 0x127   :  { %p466_p13 = scmp.ne.s32.totalorder %s573_s3, %s465_s24  ;;  %p469_p0 = scmp.lt.u32.totalorder %s465_s24, %s573_s3 }
 0x129   :  { %p471_p1 = pnand %p469_p0, %p466_p13 }
 0x12b   :  { %474 = shalt.err (!%p471_p1)
}
 0x12c   :  { %337 = dma.vmem_to_hbm [thread:$0]  %s335_s10, 128, %s573_s3, [#allocation5]  }
 0x12d   :  { %475 = dma.done.wait [#allocation3], 128  }
 0x12e   :  { %476 = vsyncadd [#allocation3], 4294967168 }
 0x12f   :  { %477 = dma.done.wait [#allocation5], 128  }
 0x130   :  { %478 = vsyncadd [#allocation5], 4294967168 }
 0x131   :  { %344 = vsyncpa [#allocation3], 1 }
 0x132   :  { %345 = vsyncpa [#allocation5], 1 }

</bundles_post_ra>
